<compile_context>
chip_gen: v5e
topology: v5e:2x2
jax: 0.10.0
libtpu: 0.0.40
codegen_flags: <defaults>
</compile_context>

<pallas_src>
import jax
import jax.numpy as jnp
from jax import lax
from jax.experimental import pallas as pl
from jax.experimental.pallas import tpu as pltpu

LANES = 128
ACC_ROWS = 8  # one f32 vreg worth of sublanes


def _device_defaults():
    """(max_tile_rows, vmem_limit_bytes, num_tensorcores) per TPU generation."""
    try:
        kind = jax.devices()[0].device_kind.lower()
    except Exception:
        return 2048, None, 1
    is_v5e = ("v5 lite" in kind) or ("v5e" in kind) or ("v5lite" in kind)
    is_v6e = ("v6" in kind)
    is_v7x = ("v7" in kind) or ("7x" in kind)
    if is_v5e:
        # 2 MiB / block (8 MiB double-buffered inputs).  Raise the scoped-VMEM
        # limit (physical VMEM is 128 MiB) so temporaries never trip the 16 MiB default.
        return 4096, 48 * 1024 * 1024, 1
    if is_v6e:
        # 4 MiB / block; 16 MiB double-buffered inputs, limit raised for headroom.
        return 8192, 48 * 1024 * 1024, 1
    if is_v7x:
        # 4 MiB / block amortizes the ~0.35 us grid-step overhead against ~3.2 TB/s
        # HBM; 16 MiB of double-buffered inputs per TensorCore (64 MiB physical).
        return 8192, 48 * 1024 * 1024, 2
    # Unknown chip (v4 / v5p / ...): keep the previously-validated conservative tile.
    return 2048, None, 2


def _make_kernel(rows: int, tile_rows: int, acc_rows: int, needs_mask: bool):
    """Build the kernel with static (rows, tile_rows, acc_rows, needs_mask) baked in."""
    blocks = tile_rows // acc_rows if acc_rows > 1 else 1

    def _tile_sum(x):
        # (tile_rows, LANES) -> (acc_rows, LANES).  For acc_rows == 8 the reshape
        # keeps the (8,128) vreg tile intact, so this is pure per-lane VPU adds.
        if acc_rows == 1:
            return jnp.sum(x, axis=0, keepdims=True)
        return jnp.sum(x.reshape(blocks, acc_rows, LANES), axis=0)

    def kernel(pred_ref, true_ref, out_ref, acc_ref):
        c = pl.program_id(0)            # core-split axis ("parallel")
        i = pl.program_id(1)            # sequential row-tile axis ("arbitrary")
        n_i = pl.num_programs(1)

        @pl.when(i == 0)
        def _():
            acc_ref[...] = jnp.zeros_like(acc_ref)

        # Cast AFTER the (possibly narrow-dtype) load; accumulate in f32.
        residual = jnp.maximum(
            pred_ref[...].astype(jnp.float32) - true_ref[...].astype(jnp.float32), 0.0
        )

        if needs_mask:
            step = c * n_i + i
            valid = rows - step * tile_rows   # <= 0 for phantom steps

            @pl.when(valid >= tile_rows)      # full tile: no mask work at all
            def _():
                acc_ref[...] += _tile_sum(residual)

            @pl.when(valid < tile_rows)       # partial / phantom tile: mask rows
            def _():
                row_ids = lax.broadcasted_iota(jnp.int32, (tile_rows, 1), 0)
                acc_ref[...] += _tile_sum(jnp.where(row_ids < valid, residual, 0.0))
        else:
            acc_ref[...] += _tile_sum(residual)

        @pl.when(i == n_i - 1)
        def _():
            # Tiny (acc_rows,128)->(1,128) cross-sublane reduce, once per core.
            out_ref[0] = jnp.sum(acc_ref[...], axis=0, keepdims=True)

    return kernel


def denoise_loss(pred: jax.Array, true: jax.Array, *, max_tile_rows: int | None = None) -> jax.Array:
    """Scalar mean(relu(pred - true)) over all elements (PyTorch Denoise.forward)."""
    assert pred.shape == true.shape
    n = pred.size

    tile_cap, vmem_limit, num_tc = _device_defaults()
    if max_tile_rows is not None:  # testing / tuning override; keep sublane-aligned
        tile_cap = max(8, (int(max_tile_rows) // 8) * 8)

    pred_flat = pred.reshape(-1)
    true_flat = true.reshape(-1)

    n_main = (n // LANES) * LANES
    total = jnp.float32(0.0)

    if n_main:
        rows = n_main // LANES
        # For lane-aligned inputs (n % 128 == 0, the common NCHW case) this
        # slice+reshape is a free bitcast.
        # TODO(synk): for non-lane-aligned n this prefix slice costs one extra HBM
        # pass per input; an in-kernel lane-masked tail (SMEM-prefetched count)
        # would avoid it.
        pred2d = pred_flat[:n_main].reshape(rows, LANES)
        true2d = true_flat[:n_main].reshape(rows, LANES)

        tile_rows = rows if rows <= tile_cap else tile_cap
        g = pl.cdiv(rows, tile_rows)            # total row tiles

        # 2-way core split only when it is free of phantom re-reads, or when the
        # chip really has 2 TensorCores and the tile count is large enough that
        # one masked re-read is negligible next to the 2x parallel win.
        if g >= 2 and g % 2 == 0:
            num_cores = 2
        elif g >= 9 and num_tc >= 2:
            num_cores = 2
        else:
            num_cores = 1
        g_per_core = pl.cdiv(g, num_cores)
        exact = (num_cores * g_per_core == g)
        needs_mask = (rows % tile_rows != 0) or (not exact)
        acc_rows = ACC_ROWS if tile_rows % ACC_ROWS == 0 else 1

        if exact:
            def in_map(c, i):
                return (c * g_per_core + i, 0)
        else:
            def in_map(c, i):
                # Phantom steps (odd g) re-read the last valid block; fully masked.
                return (jnp.minimum(c * g_per_core + i, g - 1), 0)

        cp_kwargs = dict(dimension_semantics=("parallel", "arbitrary"))
        if vmem_limit is not None:
            cp_kwargs["vmem_limit_bytes"] = vmem_limit

        read_bytes = n_main * (pred.dtype.itemsize + true.dtype.itemsize)
        partials = pl.pallas_call(
            _make_kernel(rows, tile_rows, acc_rows, needs_mask),
            out_shape=jax.ShapeDtypeStruct((num_cores, 1, LANES), jnp.float32),
            grid_spec=pltpu.PrefetchScalarGridSpec(
                num_scalar_prefetch=0,
                grid=(num_cores, g_per_core),
                in_specs=[
                    pl.BlockSpec((tile_rows, LANES), in_map),
                    pl.BlockSpec((tile_rows, LANES), in_map),
                ],
                out_specs=pl.BlockSpec((1, 1, LANES), lambda c, i: (c, 0, 0)),
                scratch_shapes=[pltpu.VMEM((acc_rows, LANES), jnp.float32)],
            ),
            compiler_params=pltpu.CompilerParams(**cp_kwargs),
            cost_estimate=pl.CostEstimate(
                flops=3 * n_main,
                bytes_accessed=int(read_bytes + num_cores * LANES * 4),
                transcendentals=0,
            ),
        )(pred2d, true2d)
        total = total + jnp.sum(partials)

    if n_main < n:
        # Ragged tail (< 128 elements): negligible, handled in plain JAX.
        tail_p = pred_flat[n_main:].astype(jnp.float32)
        tail_t = true_flat[n_main:].astype(jnp.float32)
        total = total + jnp.sum(jnp.maximum(tail_p - tail_t, 0.0))

    return (total / jnp.float32(n)).astype(jnp.float32)


def _check(shape, key, **kw):
    k_pred, k_true = jax.random.split(key)
    pred = jax.random.normal(k_pred, shape, dtype=jnp.float32)
    true = jax.random.normal(k_true, shape, dtype=jnp.float32)
    loss = denoise_loss(pred, true, **kw)
    jax.block_until_ready(loss)
    ref = jnp.mean(jnp.maximum(pred - true, 0.0))
    assert jnp.allclose(loss, ref, atol=1e-5, rtol=1e-5), (shape, kw, loss, ref)
    return loss


if __name__ == "__main__":
    key = jax.random.PRNGKey(0)
    k0, k1, k2, k3 = jax.random.split(key, 4)

    # Primary small NCHW-style case (single lane-aligned block, default tiling).
    _check((2, 4, 16, 16), k0)

    # Multi-tile grid with an even 2-way core split and no masking (forced tile).
    _check((2, 4, 256, 160), k1, max_tile_rows=256)

    # Ragged + partial last block: exercises the gated in-kernel row mask and the
    # < 128-element tail path (rows=9, tile=8 -> last block is partial).
    _check((3, 5, 7, 11), k2, max_tile_rows=8)

    # Ragged, single non-multiple-of-8 block: exercises the (1, LANES) acc path.
    _check((3, 5, 7, 11), k3)

    print("KERNEL_OK")
</pallas_src>

<mosaic_0001>
module attributes {stable_mosaic.version = 11 : i64} {
  func.func @kernel(%arg0: i32, %arg1: i32, %arg2: memref<16x128xf32, #tpu.memory_space<vmem>>, %arg3: memref<16x128xf32, #tpu.memory_space<vmem>>, %arg4: memref<1x1x128xf32, #tpu.memory_space<vmem>>, %arg5: memref<8x128xf32, #tpu.memory_space<vmem>>) attributes {dimension_semantics = [#tpu.dimension_semantics<parallel>, #tpu.dimension_semantics<arbitrary>], iteration_bounds = array<i64: 1, 1>, scalar_prefetch = 0 : i64, scratch_operands = 1 : i64, tpu.core_type = #tpu.core_type<tc>, window_params = [{transform_indices = @transform_0, window_bounds = array<i64: 16, 128>}, {transform_indices = @transform_1, window_bounds = array<i64: 16, 128>}, {transform_indices = @transform_2, window_bounds = array<i64: 1, 1, 128>}]} {
    %c0_i32 = arith.constant 0 : i32
    %0 = arith.cmpi eq, %arg1, %c0_i32 : i32
    %1 = arith.extui %0 : i1 to i32
    %c0_i32_0 = arith.constant 0 : i32
    %2 = arith.cmpi ne, %1, %c0_i32_0 : i32
    scf.if %2 {
      %cst_11 = arith.constant 0.000000e+00 : f32
      %16 = vector.broadcast %cst_11 : f32 to vector<8x128xf32>
      %c0_12 = arith.constant 0 : index
      %c0_13 = arith.constant 0 : index
      %17 = vector.load %arg5[%c0_12, %c0_13] : memref<8x128xf32, #tpu.memory_space<vmem>>, vector<8x128xf32>
      tpu.vector_store %arg5[%c0_12, %c0_13], %16 {strides = array<i32>} : memref<8x128xf32, #tpu.memory_space<vmem>>, vector<8x128xf32>,
    } else {
    }
    %c0 = arith.constant 0 : index
    %c0_1 = arith.constant 0 : index
    %3 = vector.load %arg2[%c0, %c0_1] : memref<16x128xf32, #tpu.memory_space<vmem>>, vector<16x128xf32>
    %c0_2 = arith.constant 0 : index
    %c0_3 = arith.constant 0 : index
    %4 = vector.load %arg3[%c0_2, %c0_3] : memref<16x128xf32, #tpu.memory_space<vmem>>, vector<16x128xf32>
    %5 = arith.subf %3, %4 : vector<16x128xf32>
    %cst = arith.constant 0.000000e+00 : f32
    %6 = vector.broadcast %cst : f32 to vector<16x128xf32>
    %7 = arith.maximumf %5, %6 : vector<16x128xf32>
    %c0_4 = arith.constant 0 : index
    %c0_5 = arith.constant 0 : index
    %8 = vector.load %arg5[%c0_4, %c0_5] : memref<8x128xf32, #tpu.memory_space<vmem>>, vector<8x128xf32>
    %9 = vector.shape_cast %7 : vector<16x128xf32> to vector<2x8x128xf32>
    %cst_6 = arith.constant dense<0.000000e+00> : vector<8x128xf32>
    %10 = vector.multi_reduction <add>, %9, %cst_6 [0] : vector<2x8x128xf32> to vector<8x128xf32>
    %11 = arith.addf %8, %10 : vector<8x128xf32>
    %c0_7 = arith.constant 0 : index
    %c0_8 = arith.constant 0 : index
    %12 = vector.load %arg5[%c0_7, %c0_8] : memref<8x128xf32, #tpu.memory_space<vmem>>, vector<8x128xf32>
    tpu.vector_store %arg5[%c0_7, %c0_8], %11 {strides = array<i32>} : memref<8x128xf32, #tpu.memory_space<vmem>>, vector<8x128xf32>,
    %c0_i32_9 = arith.constant 0 : i32
    %13 = arith.cmpi eq, %arg1, %c0_i32_9 : i32
    %14 = arith.extui %13 : i1 to i32
    %c0_i32_10 = arith.constant 0 : i32
    %15 = arith.cmpi ne, %14, %c0_i32_10 : i32
    scf.if %15 {
      %c0_11 = arith.constant 0 : index
      %c0_12 = arith.constant 0 : index
      %16 = vector.load %arg5[%c0_11, %c0_12] : memref<8x128xf32, #tpu.memory_space<vmem>>, vector<8x128xf32>
      %cst_13 = arith.constant dense<0.000000e+00> : vector<128xf32>
      %17 = vector.multi_reduction <add>, %16, %cst_13 [0] : vector<8x128xf32> to vector<128xf32>
      %18 = vector.shape_cast %17 : vector<128xf32> to vector<1x128xf32>
      %c0_14 = arith.constant 0 : index
      %c0_15 = arith.constant 0 : index
      %c0_16 = arith.constant 0 : index
      %19 = vector.load %arg4[%c0_14, %c0_15, %c0_16] : memref<1x1x128xf32, #tpu.memory_space<vmem>>, vector<1x1x128xf32>
      %20 = vector.shape_cast %19 : vector<1x1x128xf32> to vector<1x128xf32>
      %21 = vector.shape_cast %18 : vector<1x128xf32> to vector<1x1x128xf32>
      tpu.vector_store %arg4[%c0_14, %c0_15, %c0_16], %21 {strides = array<i32>} : memref<1x1x128xf32, #tpu.memory_space<vmem>>, vector<1x1x128xf32>,
    } else {
    }
    return
  }
  func.func @transform_0(%arg0: i32, %arg1: i32) -> (i32, i32) {
    %c1_i32 = arith.constant 1 : i32
    %0 = arith.muli %arg0, %c1_i32 : i32
    %1 = arith.addi %0, %arg1 : i32
    %c0_i32 = arith.constant 0 : i32
    %c0_i32_0 = arith.constant 0 : i32
    return %1, %c0_i32 : i32, i32
  }
  func.func @transform_1(%arg0: i32, %arg1: i32) -> (i32, i32) {
    %c1_i32 = arith.constant 1 : i32
    %0 = arith.muli %arg0, %c1_i32 : i32
    %1 = arith.addi %0, %arg1 : i32
    %c0_i32 = arith.constant 0 : i32
    %c0_i32_0 = arith.constant 0 : i32
    return %1, %c0_i32 : i32, i32
  }
  func.func @transform_2(%arg0: i32, %arg1: i32) -> (i32, i32, i32) {
    %c0_i32 = arith.constant 0 : i32
    %c0_i32_0 = arith.constant 0 : i32
    %c0_i32_1 = arith.constant 0 : i32
    return %arg0, %c0_i32, %c0_i32_0 : i32, i32, i32
  }
}

</mosaic_0001>

<bundles_post_ra>
// kernel: tpu_custom_call.1
= control target key start
LH: loop header
LB: loop body
LE: loop exit
PB: predicated region body
PF: predicated region fallthrough
CT: control target
= control target key end

     0   :  { %7 = vsyncpa [#allocation4], 0  ;;  %s214_s0 = inlined_call_operand.hbm [shape: f32[16,128], index: 0, kind: input, shape index: {}]   ;;  %s215_s1 = inlined_call_operand.hbm [shape: f32[16,128], index: 1, kind: input, shape index: {}]   ;;  %s216_s2 = inlined_call_operand.hbm [shape: f32[1,1,128], index: 2, kind: output, shape index: {}]  }
   0x1   :  { %8 = vsyncpa [#allocation7], 0 }
   0x2   :  { %9 = vsyncpa [#allocation5], 0  ;;  %s18_s11 = sshll.u32 %s214_s0, 4  ;;  %s185_s12 = smov [#allocation3]   ;;  %s19_s11 = int_to_ptr.hbm [resolvable:$true] %s18_s11 }
   0x3   :  { %s20_s13 = sshll.u32 %s185_s12, 4  ;;  %s35_s16 = sshll.u32 %s215_s1, 4  ;;  %s21_s13 = int_to_ptr.vmem [resolvable:$true] %s20_s13  ;;  %s36_s16 = int_to_ptr.hbm [resolvable:$true] %s35_s16 }
   0x4   :  { %s186_s17 = smov 128   ;;  %s187_s18 = smov 8  }
   0x5   :  { %26 = dma.hbm_to_vmem [thread:$0]  %s19_s11, 256, %s21_s13, [#allocation4], %s186_s17, %s186_s17, %s187_s18  }
   0x6   :  { %s188_s19 = smov [#allocation6]  }
   0x7   :  { %s37_s20 = sshll.u32 %s188_s19, 4  ;;  %s38_s20 = int_to_ptr.vmem [resolvable:$true] %s37_s20 }
   0x8   :  { %43 = dma.hbm_to_vmem [thread:$0]  %s36_s16, 256, %s38_s20, [#allocation7], %s186_s17, %s186_s17, %s187_s18  }
   0x9   :  { %179 = dma.done.wait [#allocation4], 256  }
   0xa   :  { %180 = vsyncadd [#allocation4], 4294967040 }
   0xb   :  { %181 = dma.done.wait [#allocation7], 256  }
   0xc   :  { %182 = vsyncadd [#allocation7], 4294967040  ;;  %v61_v0 = vld [vmem:[#allocation3] sm:$0xff]  ;;  %v62_v1 = vld [vmem:[#allocation3 + $0x8] sm:$0xff]  ;;  %s189_s0 = smov [#allocation8]   ;;  %s91_s23 = sshll.u32 %s216_s2, 4  ;;  %s92_s23 = int_to_ptr.hbm [resolvable:$true] %s91_s23 }
   0xd   :  { %v63_v2 = vld [vmem:[#allocation6] sm:$0xff]  ;;  %v64_v3 = vld [vmem:[#allocation6 + $0x8] sm:$0xff]  ;;  %s89_s1 = sshll.u32 %s189_s0, 4  ;;  %s90_s1 = int_to_ptr.vmem [resolvable:$true] %s89_s1 }
   0xe   :  { %v65_v4 = vsub.f32 %v61_v0, %v63_v2  ;;  %v66_v5 = vsub.f32 %v62_v1, %v64_v3 }
  0x10   :  { %v67_v6 = vmax.f32 %v65_v4, 0.0  ;;  %v68_v7 = vmax.f32 %v66_v5, 0.0 }
  0x12   :  { %v70_v8 = vadd.f32 %v68_v7, %v67_v6 }
  0x14   :  { %v77_v9 = vrot.slane %v70_v8, 4 }
  0x16   :  { %v78_v10 = vadd.f32 %v77_v9, %v70_v8 }
  0x18   :  { %v79_v11 = vrot.slane %v78_v10, 2 }
  0x1a   :  { %v80_v12 = vadd.f32 %v79_v11, %v78_v10 }
  0x1c   :  { %v81_v13 = vrot.slane %v80_v12, 1 }
  0x1e   :  { %v82_v14 = vadd.f32 %v81_v13, %v80_v12 }
  0x20   :  { %83 = vst [vmem:[#allocation8] sm:$0x1] %v82_v14 }
  0x21   :  { %94 = dma.vmem_to_hbm [thread:$0]  %s90_s1, 16, %s92_s23, [#allocation5]  }
  0x22   :  { %183 = dma.done.wait [#allocation5], 16  }
  0x23   :  { %184 = vsyncadd [#allocation5], 4294967280 }
  0x24   :  { %99 = vsyncpa [#allocation4], 1 }
  0x25   :  { %100 = vsyncpa [#allocation7], 1 }
  0x26   :  { %101 = vsyncpa [#allocation5], 1 }

</bundles_post_ra>
